<compile_context>
chip_gen: v7x
topology: tpu7x:2x2x1
jax: 0.10.0
libtpu: 0.0.40
codegen_flags: <defaults>
</compile_context>

<pallas_src>
import functools
import math

import jax
import jax.numpy as jnp
from jax.experimental import pallas as pl
from jax.experimental.pallas import tpu as pltpu


def _cross_attn_kernel(tgt_ref, qpos_ref, mem_ref, kpos_ref,
                       wqT_ref, wkT_ref, wvT_ref,
                       bq_ref, bk_ref, bv_ref,
                       woT_ref, bo_ref,
                       lnw_ref, lnb_ref,
                       out_ref,
                       att_ref,
                       *, b_blk, lq, lk, nhead, head_dim, eps):
    f32 = jnp.float32
    bf16 = jnp.bfloat16
    rows_q = b_blk * lq

    tgt = tgt_ref[...]                                    # (rows_q, D) f32
    q_in = (tgt + qpos_ref[...]).astype(bf16)             # with_pos_embed(tgt, query_pos)
    k_in = (mem_ref[...] + kpos_ref[...]).astype(bf16)    # with_pos_embed(memory, pos)
    v_in = mem_ref[...].astype(bf16)                      # value = memory (no pos)

    # In-projections over all rows of the batch block at once (one weight
    # push each).  1/sqrt(head_dim) is already folded into wqT / bq.
    q = (jnp.dot(q_in, wqT_ref[...], preferred_element_type=f32)
         + bq_ref[...]).astype(bf16)
    k = (jnp.dot(k_in, wkT_ref[...], preferred_element_type=f32)
         + bk_ref[...]).astype(bf16)
    v = (jnp.dot(v_in, wvT_ref[...], preferred_element_type=f32)
         + bv_ref[...]).astype(bf16)

    # Per-head attention, batched over the batch block.  Each head's output
    # is written to its lane slice of the VMEM scratch slab; the output
    # projection is then one full-width matmul.
    for h in range(nhead):
        lo = h * head_dim
        hi = lo + head_dim
        qh = q[:, lo:hi].reshape(b_blk, lq, head_dim)     # (b, lq, hd)
        kh = k[:, lo:hi].reshape(b_blk, lk, head_dim)     # (b, lk, hd)
        vh = v[:, lo:hi].reshape(b_blk, lk, head_dim)     # (b, lk, hd)

        s = jnp.einsum('bqd,bkd->bqk', qh, kh,
                       preferred_element_type=f32)        # (b, lq, lk) f32
        s = s - jnp.max(s, axis=-1, keepdims=True)
        p = jnp.exp(s)
        denom = jnp.sum(p, axis=-1, keepdims=True)        # (b, lq, 1) f32

        oh = jnp.einsum('bqk,bkd->bqd', p.astype(bf16), vh,
                        preferred_element_type=f32)       # (b, lq, hd) f32
        # Normalization applied to the (hd)-wide result, not the (lk)-wide
        # probabilities; EUP approx reciprocal is effectively free.
        oh = oh * pl.reciprocal(denom, approx=True)
        att_ref[:, lo:hi] = oh.reshape(rows_q, head_dim)

    # Single output projection over the concatenated heads.
    o = jnp.dot(att_ref[...].astype(bf16), woT_ref[...],
                preferred_element_type=f32) + bo_ref[...]

    # Residual (dropout = 0) + LayerNorm over last dim, all in f32.
    res = tgt + o
    mu = jnp.mean(res, axis=-1, keepdims=True)
    xc = res - mu
    var = jnp.mean(xc * xc, axis=-1, keepdims=True)
    y = xc * jax.lax.rsqrt(var + eps) * lnw_ref[...] + lnb_ref[...]

    out_ref[...] = y.astype(out_ref.dtype)


def _pick_batch_block(B, Lq, Lk):
    """Batches per grid step: aim for >=128 query rows per step, divisor of B."""
    target = (128 + Lq - 1) // Lq
    bb = min(B, max(1, target))
    while B % bb != 0:
        bb -= 1
    # (8,128) rule: when a block is not the full array, sublane dims must be
    # multiples of 8.
    if B // bb > 1 and ((bb * Lq) % 8 != 0 or (bb * Lk) % 8 != 0):
        bb = B
    return bb


def cross_attention_layer(tgt, memory, params, *, nhead,
                          pos=None, query_pos=None):
    """tgt: (Lq, B, D), memory: (Lk, B, D) — PyTorch seq-first convention."""
    Lq, B, D = tgt.shape
    Lk = memory.shape[0]
    head_dim = D // nhead
    assert head_dim * nhead == D

    if pos is None:
        pos = jnp.zeros_like(memory)
    if query_pos is None:
        query_pos = jnp.zeros_like(tgt)

    # Flatten to batch-major 2D row blocks: (B*L, D).
    tgt2 = jnp.transpose(tgt, (1, 0, 2)).reshape(B * Lq, D)
    qpos2 = jnp.transpose(query_pos, (1, 0, 2)).reshape(B * Lq, D)
    mem2 = jnp.transpose(memory, (1, 0, 2)).reshape(B * Lk, D)
    kpos2 = jnp.transpose(pos, (1, 0, 2)).reshape(B * Lk, D)

    scale = 1.0 / math.sqrt(head_dim)

    # Split in_proj, pre-transpose (x @ W.T -> x @ Wt), fold the softmax scale
    # into the Q projection, cast matmul weights to bf16.
    w_in = params["in_proj_weight"]               # (3D, D)
    b_in = params["in_proj_bias"]                 # (3D,)
    wqT = (w_in[0 * D:1 * D].T * scale).astype(jnp.bfloat16)
    wkT = w_in[1 * D:2 * D].T.astype(jnp.bfloat16)
    wvT = w_in[2 * D:3 * D].T.astype(jnp.bfloat16)
    bq = (b_in[0 * D:1 * D] * scale).reshape(1, D).astype(jnp.float32)
    bk = b_in[1 * D:2 * D].reshape(1, D).astype(jnp.float32)
    bv = b_in[2 * D:3 * D].reshape(1, D).astype(jnp.float32)
    woT = params["out_proj_weight"].T.astype(jnp.bfloat16)
    bo = params["out_proj_bias"].reshape(1, D).astype(jnp.float32)
    lnw = params["ln_weight"].reshape(1, D).astype(jnp.float32)
    lnb = params["ln_bias"].reshape(1, D).astype(jnp.float32)

    bb = _pick_batch_block(B, Lq, Lk)
    n_steps = B // bb

    row_q = pl.BlockSpec((bb * Lq, D), lambda i: (i, 0))
    row_k = pl.BlockSpec((bb * Lk, D), lambda i: (i, 0))
    mat = pl.BlockSpec((D, D), lambda i: (0, 0))
    vec = pl.BlockSpec((1, D), lambda i: (0, 0))

    kernel = functools.partial(_cross_attn_kernel,
                               b_blk=bb, lq=Lq, lk=Lk,
                               nhead=nhead, head_dim=head_dim, eps=1e-5)

    out2 = pl.pallas_call(
        kernel,
        out_shape=jax.ShapeDtypeStruct((B * Lq, D), jnp.float32),
        grid=(n_steps,),
        in_specs=[row_q, row_q, row_k, row_k,
                  mat, mat, mat,
                  vec, vec, vec,
                  mat, vec,
                  vec, vec],
        out_specs=pl.BlockSpec((bb * Lq, D), lambda i: (i, 0)),
        scratch_shapes=[pltpu.VMEM((bb * Lq, D), jnp.float32)],
        compiler_params=pltpu.CompilerParams(
            dimension_semantics=("parallel",)),
    )(tgt2, qpos2, mem2, kpos2,
      wqT, wkT, wvT, bq, bk, bv, woT, bo, lnw, lnb)

    out_b = out2.reshape(B, Lq, D)
    return jnp.transpose(out_b, (1, 0, 2))        # back to (Lq, B, D)


def _reference(tgt, memory, params, *, nhead, pos, query_pos):
    """Pure-JAX f32 reference of forward_post (dropout=0, no masks)."""
    Lq, B, D = tgt.shape
    hd = D // nhead
    w_in, b_in = params["in_proj_weight"], params["in_proj_bias"]
    q_in = tgt + query_pos
    k_in = memory + pos
    q = jnp.einsum("lbd,ed->lbe", q_in, w_in[:D]) + b_in[:D]
    k = jnp.einsum("lbd,ed->lbe", k_in, w_in[D:2 * D]) + b_in[D:2 * D]
    v = jnp.einsum("lbd,ed->lbe", memory, w_in[2 * D:]) + b_in[2 * D:]

    def heads(x):  # (L, B, D) -> (B, H, L, hd)
        L = x.shape[0]
        return jnp.transpose(x.reshape(L, B, nhead, hd), (1, 2, 0, 3))

    qh, kh, vh = heads(q), heads(k), heads(v)
    s = jnp.einsum("bhqd,bhkd->bhqk", qh, kh) / math.sqrt(hd)
    p = jax.nn.softmax(s, axis=-1)
    o = jnp.einsum("bhqk,bhkd->bhqd", p, vh)           # (B, H, Lq, hd)
    o = jnp.transpose(o, (2, 0, 1, 3)).reshape(Lq, B, D)
    o = jnp.einsum("lbd,ed->lbe", o, params["out_proj_weight"]) + params["out_proj_bias"]
    res = tgt + o
    mu = jnp.mean(res, axis=-1, keepdims=True)
    var = jnp.mean((res - mu) ** 2, axis=-1, keepdims=True)
    return (res - mu) / jnp.sqrt(var + 1e-5) * params["ln_weight"] + params["ln_bias"]


if __name__ == "__main__":
    B, nhead, D = 2, 4, 32
    Lq, Lk = 8, 16

    key = jax.random.PRNGKey(0)
    ks = jax.random.split(key, 10)

    def xavier(k, shape):
        fan_in, fan_out = shape[1], shape[0]
        a = math.sqrt(6.0 / (fan_in + fan_out))
        return jax.random.uniform(k, shape, jnp.float32, -a, a)

    params = {
        "in_proj_weight": xavier(ks[0], (3 * D, D)),
        "in_proj_bias": 0.01 * jax.random.normal(ks[1], (3 * D,), jnp.float32),
        "out_proj_weight": xavier(ks[2], (D, D)),
        "out_proj_bias": 0.01 * jax.random.normal(ks[3], (D,), jnp.float32),
        "ln_weight": 1.0 + 0.01 * jax.random.normal(ks[4], (D,), jnp.float32),
        "ln_bias": 0.01 * jax.random.normal(ks[5], (D,), jnp.float32),
    }

    tgt = jax.random.normal(ks[6], (Lq, B, D), jnp.float32)
    memory = jax.random.normal(ks[7], (Lk, B, D), jnp.float32)
    query_pos = jax.random.normal(ks[8], (Lq, B, D), jnp.float32)
    pos = jax.random.normal(ks[9], (Lk, B, D), jnp.float32)

    fwd = jax.jit(functools.partial(cross_attention_layer, nhead=nhead))
    out = fwd(tgt, memory, params, pos=pos, query_pos=query_pos)
    out = jax.block_until_ready(out)

    ref = _reference(tgt, memory, params, nhead=nhead, pos=pos, query_pos=query_pos)
    assert out.shape == (Lq, B, D)
    # bf16 matmul operands + approx reciprocal -> relaxed tolerance vs f32 ref.
    assert jnp.allclose(out, ref, rtol=5e-2, atol=5e-2), "mismatch vs reference"

    print("KERNEL_OK")
</pallas_src>

<mosaic_0001>
module attributes {stable_mosaic.version = 11 : i64} {
  func.func @_cross_attn_kernel(%arg0: i32, %arg1: memref<16x32xf32, #tpu.memory_space<vmem>>, %arg2: memref<16x32xf32, #tpu.memory_space<vmem>>, %arg3: memref<32x32xf32, #tpu.memory_space<vmem>>, %arg4: memref<32x32xf32, #tpu.memory_space<vmem>>, %arg5: memref<32x32xbf16, #tpu.memory_space<vmem>>, %arg6: memref<32x32xbf16, #tpu.memory_space<vmem>>, %arg7: memref<32x32xbf16, #tpu.memory_space<vmem>>, %arg8: memref<1x32xf32, #tpu.memory_space<vmem>>, %arg9: memref<1x32xf32, #tpu.memory_space<vmem>>, %arg10: memref<1x32xf32, #tpu.memory_space<vmem>>, %arg11: memref<32x32xbf16, #tpu.memory_space<vmem>>, %arg12: memref<1x32xf32, #tpu.memory_space<vmem>>, %arg13: memref<1x32xf32, #tpu.memory_space<vmem>>, %arg14: memref<1x32xf32, #tpu.memory_space<vmem>>, %arg15: memref<16x32xf32, #tpu.memory_space<vmem>>, %arg16: memref<16x32xf32, #tpu.memory_space<vmem>>) attributes {dimension_semantics = [#tpu.dimension_semantics<parallel>], iteration_bounds = array<i64: 1>, scalar_prefetch = 0 : i64, scratch_operands = 1 : i64, tpu.core_type = #tpu.core_type<tc>, window_params = [{transform_indices = @transform_0, window_bounds = array<i64: 16, 32>}, {transform_indices = @transform_1, window_bounds = array<i64: 16, 32>}, {transform_indices = @transform_2, window_bounds = array<i64: 32, 32>}, {transform_indices = @transform_3, window_bounds = array<i64: 32, 32>}, {pipeline_mode = #tpu.pipeline_mode<synchronous>, transform_indices = @transform_4, window_bounds = array<i64: 32, 32>}, {pipeline_mode = #tpu.pipeline_mode<synchronous>, transform_indices = @transform_5, window_bounds = array<i64: 32, 32>}, {pipeline_mode = #tpu.pipeline_mode<synchronous>, transform_indices = @transform_6, window_bounds = array<i64: 32, 32>}, {pipeline_mode = #tpu.pipeline_mode<synchronous>, transform_indices = @transform_7, window_bounds = array<i64: 1, 32>}, {pipeline_mode = #tpu.pipeline_mode<synchronous>, transform_indices = @transform_8, window_bounds = array<i64: 1, 32>}, {pipeline_mode = #tpu.pipeline_mode<synchronous>, transform_indices = @transform_9, window_bounds = array<i64: 1, 32>}, {pipeline_mode = #tpu.pipeline_mode<synchronous>, transform_indices = @transform_10, window_bounds = array<i64: 32, 32>}, {pipeline_mode = #tpu.pipeline_mode<synchronous>, transform_indices = @transform_11, window_bounds = array<i64: 1, 32>}, {pipeline_mode = #tpu.pipeline_mode<synchronous>, transform_indices = @transform_12, window_bounds = array<i64: 1, 32>}, {pipeline_mode = #tpu.pipeline_mode<synchronous>, transform_indices = @transform_13, window_bounds = array<i64: 1, 32>}, {transform_indices = @transform_14, window_bounds = array<i64: 16, 32>}]} {
    %c0 = arith.constant 0 : index
    %c0_0 = arith.constant 0 : index
    %0 = vector.load %arg1[%c0, %c0_0] : memref<16x32xf32, #tpu.memory_space<vmem>>, vector<16x32xf32>
    %c0_1 = arith.constant 0 : index
    %c0_2 = arith.constant 0 : index
    %1 = vector.load %arg2[%c0_1, %c0_2] : memref<16x32xf32, #tpu.memory_space<vmem>>, vector<16x32xf32>
    %2 = arith.addf %0, %1 : vector<16x32xf32>
    %3 = arith.truncf %2 : vector<16x32xf32> to vector<16x32xbf16>
    %c0_3 = arith.constant 0 : index
    %c0_4 = arith.constant 0 : index
    %4 = vector.load %arg3[%c0_3, %c0_4] : memref<32x32xf32, #tpu.memory_space<vmem>>, vector<32x32xf32>
    %c0_5 = arith.constant 0 : index
    %c0_6 = arith.constant 0 : index
    %5 = vector.load %arg4[%c0_5, %c0_6] : memref<32x32xf32, #tpu.memory_space<vmem>>, vector<32x32xf32>
    %6 = arith.addf %4, %5 : vector<32x32xf32>
    %7 = arith.truncf %6 : vector<32x32xf32> to vector<32x32xbf16>
    %c0_7 = arith.constant 0 : index
    %c0_8 = arith.constant 0 : index
    %8 = vector.load %arg3[%c0_7, %c0_8] : memref<32x32xf32, #tpu.memory_space<vmem>>, vector<32x32xf32>
    %9 = arith.truncf %8 : vector<32x32xf32> to vector<32x32xbf16>
    %c0_9 = arith.constant 0 : index
    %c0_10 = arith.constant 0 : index
    %10 = vector.load %arg5[%c0_9, %c0_10] : memref<32x32xbf16, #tpu.memory_space<vmem>>, vector<32x32xbf16>
    %cst = arith.constant dense<0.000000e+00> : vector<16x32xf32>
    %11 = tpu.matmul %3, %10, %cst {dimension_numbers = #tpu.dot_dimension_numbers<[1], [0], [0], [1], [0, 0, 1, 1], [], []>} : vector<16x32xbf16>, vector<32x32xbf16>, vector<16x32xf32> -> vector<16x32xf32>
    %c0_11 = arith.constant 0 : index
    %c0_12 = arith.constant 0 : index
    %12 = vector.load %arg8[%c0_11, %c0_12] : memref<1x32xf32, #tpu.memory_space<vmem>>, vector<1x32xf32>
    %13 = vector.broadcast %12 : vector<1x32xf32> to vector<16x32xf32>
    %14 = arith.addf %11, %13 : vector<16x32xf32>
    %15 = arith.truncf %14 : vector<16x32xf32> to vector<16x32xbf16>
    %c0_13 = arith.constant 0 : index
    %c0_14 = arith.constant 0 : index
    %16 = vector.load %arg6[%c0_13, %c0_14] : memref<32x32xbf16, #tpu.memory_space<vmem>>, vector<32x32xbf16>
    %cst_15 = arith.constant dense<0.000000e+00> : vector<32x32xf32>
    %17 = tpu.matmul %7, %16, %cst_15 {dimension_numbers = #tpu.dot_dimension_numbers<[1], [0], [0], [1], [0, 0, 1, 1], [], []>} : vector<32x32xbf16>, vector<32x32xbf16>, vector<32x32xf32> -> vector<32x32xf32>
    %c0_16 = arith.constant 0 : index
    %c0_17 = arith.constant 0 : index
    %18 = vector.load %arg9[%c0_16, %c0_17] : memref<1x32xf32, #tpu.memory_space<vmem>>, vector<1x32xf32>
    %19 = vector.broadcast %18 : vector<1x32xf32> to vector<32x32xf32>
    %20 = arith.addf %17, %19 : vector<32x32xf32>
    %21 = arith.truncf %20 : vector<32x32xf32> to vector<32x32xbf16>
    %c0_18 = arith.constant 0 : index
    %c0_19 = arith.constant 0 : index
    %22 = vector.load %arg7[%c0_18, %c0_19] : memref<32x32xbf16, #tpu.memory_space<vmem>>, vector<32x32xbf16>
    %cst_20 = arith.constant dense<0.000000e+00> : vector<32x32xf32>
    %23 = tpu.matmul %9, %22, %cst_20 {dimension_numbers = #tpu.dot_dimension_numbers<[1], [0], [0], [1], [0, 0, 1, 1], [], []>} : vector<32x32xbf16>, vector<32x32xbf16>, vector<32x32xf32> -> vector<32x32xf32>
    %c0_21 = arith.constant 0 : index
    %c0_22 = arith.constant 0 : index
    %24 = vector.load %arg10[%c0_21, %c0_22] : memref<1x32xf32, #tpu.memory_space<vmem>>, vector<1x32xf32>
    %25 = vector.broadcast %24 : vector<1x32xf32> to vector<32x32xf32>
    %26 = arith.addf %23, %25 : vector<32x32xf32>
    %27 = arith.truncf %26 : vector<32x32xf32> to vector<32x32xbf16>
    %28 = vector.extract_strided_slice %15 {offsets = [0, 0], sizes = [16, 8], strides = [1, 1]} : vector<16x32xbf16> to vector<16x8xbf16>
    %29 = vector.shape_cast %28 : vector<16x8xbf16> to vector<2x8x8xbf16>
    %30 = vector.extract_strided_slice %21 {offsets = [0, 0], sizes = [32, 8], strides = [1, 1]} : vector<32x32xbf16> to vector<32x8xbf16>
    %31 = vector.shape_cast %30 : vector<32x8xbf16> to vector<2x16x8xbf16>
    %32 = vector.extract_strided_slice %27 {offsets = [0, 0], sizes = [32, 8], strides = [1, 1]} : vector<32x32xbf16> to vector<32x8xbf16>
    %33 = vector.shape_cast %32 : vector<32x8xbf16> to vector<2x16x8xbf16>
    "tpu.trace_start"() <{level = 10 : i32, message = "bqd,bkd->bqk"}> : () -> ()
    %cst_23 = arith.constant dense<0.000000e+00> : vector<2x8x16xf32>
    %34 = tpu.matmul %29, %31, %cst_23 {dimension_numbers = #tpu.dot_dimension_numbers<[2], [2], [1], [1], [0, 0, 0, 1, 1, 1], [0], [0]>} : vector<2x8x8xbf16>, vector<2x16x8xbf16>, vector<2x8x16xf32> -> vector<2x8x16xf32>
    "tpu.trace_stop"() : () -> ()
    %cst_24 = arith.constant dense<0xFF800000> : vector<2x8xf32>
    %35 = vector.multi_reduction <maximumf>, %34, %cst_24 [2] : vector<2x8x16xf32> to vector<2x8xf32>
    %36 = vector.shape_cast %35 : vector<2x8xf32> to vector<2x8x1xf32>
    %37 = vector.broadcast %36 : vector<2x8x1xf32> to vector<2x8x16xf32>
    %38 = arith.subf %34, %37 : vector<2x8x16xf32>
    %39 = math.exp %38 : vector<2x8x16xf32>
    %cst_25 = arith.constant dense<0.000000e+00> : vector<2x8xf32>
    %40 = vector.multi_reduction <add>, %39, %cst_25 [2] : vector<2x8x16xf32> to vector<2x8xf32>
    %41 = vector.shape_cast %40 : vector<2x8xf32> to vector<2x8x1xf32>
    %42 = arith.truncf %39 : vector<2x8x16xf32> to vector<2x8x16xbf16>
    "tpu.trace_start"() <{level = 10 : i32, message = "bqk,bkd->bqd"}> : () -> ()
    %cst_26 = arith.constant dense<0.000000e+00> : vector<2x8x8xf32>
    %43 = tpu.matmul %42, %33, %cst_26 {dimension_numbers = #tpu.dot_dimension_numbers<[2], [1], [1], [2], [0, 0, 0, 1, 1, 2], [0], [0]>} : vector<2x8x16xbf16>, vector<2x16x8xbf16>, vector<2x8x8xf32> -> vector<2x8x8xf32>
    "tpu.trace_stop"() : () -> ()
    %44 = tpu.reciprocal %41 {approx = true} : vector<2x8x1xf32> -> vector<2x8x1xf32>
    %45 = vector.broadcast %44 : vector<2x8x1xf32> to vector<2x8x8xf32>
    %46 = arith.mulf %43, %45 : vector<2x8x8xf32>
    %47 = vector.shape_cast %46 : vector<2x8x8xf32> to vector<16x8xf32>
    %c0_27 = arith.constant 0 : index
    %c0_28 = arith.constant 0 : index
    %48 = vector.load %arg16[%c0_27, %c0_28] : memref<16x32xf32, #tpu.memory_space<vmem>>, vector<16x8xf32>
    tpu.vector_store %arg16[%c0_27, %c0_28], %47 {strides = array<i32>} : memref<16x32xf32, #tpu.memory_space<vmem>>, vector<16x8xf32>,
    %49 = vector.extract_strided_slice %15 {offsets = [0, 8], sizes = [16, 8], strides = [1, 1]} : vector<16x32xbf16> to vector<16x8xbf16>
    %50 = vector.shape_cast %49 : vector<16x8xbf16> to vector<2x8x8xbf16>
    %51 = vector.extract_strided_slice %21 {offsets = [0, 8], sizes = [32, 8], strides = [1, 1]} : vector<32x32xbf16> to vector<32x8xbf16>
    %52 = vector.shape_cast %51 : vector<32x8xbf16> to vector<2x16x8xbf16>
    %53 = vector.extract_strided_slice %27 {offsets = [0, 8], sizes = [32, 8], strides = [1, 1]} : vector<32x32xbf16> to vector<32x8xbf16>
    %54 = vector.shape_cast %53 : vector<32x8xbf16> to vector<2x16x8xbf16>
    "tpu.trace_start"() <{level = 10 : i32, message = "bqd,bkd->bqk"}> : () -> ()
    %cst_29 = arith.constant dense<0.000000e+00> : vector<2x8x16xf32>
    %55 = tpu.matmul %50, %52, %cst_29 {dimension_numbers = #tpu.dot_dimension_numbers<[2], [2], [1], [1], [0, 0, 0, 1, 1, 1], [0], [0]>} : vector<2x8x8xbf16>, vector<2x16x8xbf16>, vector<2x8x16xf32> -> vector<2x8x16xf32>
    "tpu.trace_stop"() : () -> ()
    %cst_30 = arith.constant dense<0xFF800000> : vector<2x8xf32>
    %56 = vector.multi_reduction <maximumf>, %55, %cst_30 [2] : vector<2x8x16xf32> to vector<2x8xf32>
    %57 = vector.shape_cast %56 : vector<2x8xf32> to vector<2x8x1xf32>
    %58 = vector.broadcast %57 : vector<2x8x1xf32> to vector<2x8x16xf32>
    %59 = arith.subf %55, %58 : vector<2x8x16xf32>
    %60 = math.exp %59 : vector<2x8x16xf32>
    %cst_31 = arith.constant dense<0.000000e+00> : vector<2x8xf32>
    %61 = vector.multi_reduction <add>, %60, %cst_31 [2] : vector<2x8x16xf32> to vector<2x8xf32>
    %62 = vector.shape_cast %61 : vector<2x8xf32> to vector<2x8x1xf32>
    %63 = arith.truncf %60 : vector<2x8x16xf32> to vector<2x8x16xbf16>
    "tpu.trace_start"() <{level = 10 : i32, message = "bqk,bkd->bqd"}> : () -> ()
    %cst_32 = arith.constant dense<0.000000e+00> : vector<2x8x8xf32>
    %64 = tpu.matmul %63, %54, %cst_32 {dimension_numbers = #tpu.dot_dimension_numbers<[2], [1], [1], [2], [0, 0, 0, 1, 1, 2], [0], [0]>} : vector<2x8x16xbf16>, vector<2x16x8xbf16>, vector<2x8x8xf32> -> vector<2x8x8xf32>
    "tpu.trace_stop"() : () -> ()
    %65 = tpu.reciprocal %62 {approx = true} : vector<2x8x1xf32> -> vector<2x8x1xf32>
    %66 = vector.broadcast %65 : vector<2x8x1xf32> to vector<2x8x8xf32>
    %67 = arith.mulf %64, %66 : vector<2x8x8xf32>
    %68 = vector.shape_cast %67 : vector<2x8x8xf32> to vector<16x8xf32>
    %c0_33 = arith.constant 0 : index
    %c8 = arith.constant 8 : index
    %69 = vector.load %arg16[%c0_33, %c8] : memref<16x32xf32, #tpu.memory_space<vmem>>, vector<16x8xf32>
    tpu.vector_store %arg16[%c0_33, %c8], %68 {strides = array<i32>} : memref<16x32xf32, #tpu.memory_space<vmem>>, vector<16x8xf32>,
    %70 = vector.extract_strided_slice %15 {offsets = [0, 16], sizes = [16, 8], strides = [1, 1]} : vector<16x32xbf16> to vector<16x8xbf16>
    %71 = vector.shape_cast %70 : vector<16x8xbf16> to vector<2x8x8xbf16>
    %72 = vector.extract_strided_slice %21 {offsets = [0, 16], sizes = [32, 8], strides = [1, 1]} : vector<32x32xbf16> to vector<32x8xbf16>
    %73 = vector.shape_cast %72 : vector<32x8xbf16> to vector<2x16x8xbf16>
    %74 = vector.extract_strided_slice %27 {offsets = [0, 16], sizes = [32, 8], strides = [1, 1]} : vector<32x32xbf16> to vector<32x8xbf16>
    %75 = vector.shape_cast %74 : vector<32x8xbf16> to vector<2x16x8xbf16>
    "tpu.trace_start"() <{level = 10 : i32, message = "bqd,bkd->bqk"}> : () -> ()
    %cst_34 = arith.constant dense<0.000000e+00> : vector<2x8x16xf32>
    %76 = tpu.matmul %71, %73, %cst_34 {dimension_numbers = #tpu.dot_dimension_numbers<[2], [2], [1], [1], [0, 0, 0, 1, 1, 1], [0], [0]>} : vector<2x8x8xbf16>, vector<2x16x8xbf16>, vector<2x8x16xf32> -> vector<2x8x16xf32>
    "tpu.trace_stop"() : () -> ()
    %cst_35 = arith.constant dense<0xFF800000> : vector<2x8xf32>
    %77 = vector.multi_reduction <maximumf>, %76, %cst_35 [2] : vector<2x8x16xf32> to vector<2x8xf32>
    %78 = vector.shape_cast %77 : vector<2x8xf32> to vector<2x8x1xf32>
    %79 = vector.broadcast %78 : vector<2x8x1xf32> to vector<2x8x16xf32>
    %80 = arith.subf %76, %79 : vector<2x8x16xf32>
    %81 = math.exp %80 : vector<2x8x16xf32>
    %cst_36 = arith.constant dense<0.000000e+00> : vector<2x8xf32>
    %82 = vector.multi_reduction <add>, %81, %cst_36 [2] : vector<2x8x16xf32> to vector<2x8xf32>
    %83 = vector.shape_cast %82 : vector<2x8xf32> to vector<2x8x1xf32>
    %84 = arith.truncf %81 : vector<2x8x16xf32> to vector<2x8x16xbf16>
    "tpu.trace_start"() <{level = 10 : i32, message = "bqk,bkd->bqd"}> : () -> ()
    %cst_37 = arith.constant dense<0.000000e+00> : vector<2x8x8xf32>
    %85 = tpu.matmul %84, %75, %cst_37 {dimension_numbers = #tpu.dot_dimension_numbers<[2], [1], [1], [2], [0, 0, 0, 1, 1, 2], [0], [0]>} : vector<2x8x16xbf16>, vector<2x16x8xbf16>, vector<2x8x8xf32> -> vector<2x8x8xf32>
    "tpu.trace_stop"() : () -> ()
    %86 = tpu.reciprocal %83 {approx = true} : vector<2x8x1xf32> -> vector<2x8x1xf32>
    %87 = vector.broadcast %86 : vector<2x8x1xf32> to vector<2x8x8xf32>
    %88 = arith.mulf %85, %87 : vector<2x8x8xf32>
    %89 = vector.shape_cast %88 : vector<2x8x8xf32> to vector<16x8xf32>
    %c0_38 = arith.constant 0 : index
    %c16 = arith.constant 16 : index
    %90 = vector.load %arg16[%c0_38, %c16] : memref<16x32xf32, #tpu.memory_space<vmem>>, vector<16x8xf32>
    tpu.vector_store %arg16[%c0_38, %c16], %89 {strides = array<i32>} : memref<16x32xf32, #tpu.memory_space<vmem>>, vector<16x8xf32>,
    %91 = vector.extract_strided_slice %15 {offsets = [0, 24], sizes = [16, 8], strides = [1, 1]} : vector<16x32xbf16> to vector<16x8xbf16>
    %92 = vector.shape_cast %91 : vector<16x8xbf16> to vector<2x8x8xbf16>
    %93 = vector.extract_strided_slice %21 {offsets = [0, 24], sizes = [32, 8], strides = [1, 1]} : vector<32x32xbf16> to vector<32x8xbf16>
    %94 = vector.shape_cast %93 : vector<32x8xbf16> to vector<2x16x8xbf16>
    %95 = vector.extract_strided_slice %27 {offsets = [0, 24], sizes = [32, 8], strides = [1, 1]} : vector<32x32xbf16> to vector<32x8xbf16>
    %96 = vector.shape_cast %95 : vector<32x8xbf16> to vector<2x16x8xbf16>
    "tpu.trace_start"() <{level = 10 : i32, message = "bqd,bkd->bqk"}> : () -> ()
    %cst_39 = arith.constant dense<0.000000e+00> : vector<2x8x16xf32>
    %97 = tpu.matmul %92, %94, %cst_39 {dimension_numbers = #tpu.dot_dimension_numbers<[2], [2], [1], [1], [0, 0, 0, 1, 1, 1], [0], [0]>} : vector<2x8x8xbf16>, vector<2x16x8xbf16>, vector<2x8x16xf32> -> vector<2x8x16xf32>
    "tpu.trace_stop"() : () -> ()
    %cst_40 = arith.constant dense<0xFF800000> : vector<2x8xf32>
    %98 = vector.multi_reduction <maximumf>, %97, %cst_40 [2] : vector<2x8x16xf32> to vector<2x8xf32>
    %99 = vector.shape_cast %98 : vector<2x8xf32> to vector<2x8x1xf32>
    %100 = vector.broadcast %99 : vector<2x8x1xf32> to vector<2x8x16xf32>
    %101 = arith.subf %97, %100 : vector<2x8x16xf32>
    %102 = math.exp %101 : vector<2x8x16xf32>
    %cst_41 = arith.constant dense<0.000000e+00> : vector<2x8xf32>
    %103 = vector.multi_reduction <add>, %102, %cst_41 [2] : vector<2x8x16xf32> to vector<2x8xf32>
    %104 = vector.shape_cast %103 : vector<2x8xf32> to vector<2x8x1xf32>
    %105 = arith.truncf %102 : vector<2x8x16xf32> to vector<2x8x16xbf16>
    "tpu.trace_start"() <{level = 10 : i32, message = "bqk,bkd->bqd"}> : () -> ()
    %cst_42 = arith.constant dense<0.000000e+00> : vector<2x8x8xf32>
    %106 = tpu.matmul %105, %96, %cst_42 {dimension_numbers = #tpu.dot_dimension_numbers<[2], [1], [1], [2], [0, 0, 0, 1, 1, 2], [0], [0]>} : vector<2x8x16xbf16>, vector<2x16x8xbf16>, vector<2x8x8xf32> -> vector<2x8x8xf32>
    "tpu.trace_stop"() : () -> ()
    %107 = tpu.reciprocal %104 {approx = true} : vector<2x8x1xf32> -> vector<2x8x1xf32>
    %108 = vector.broadcast %107 : vector<2x8x1xf32> to vector<2x8x8xf32>
    %109 = arith.mulf %106, %108 : vector<2x8x8xf32>
    %110 = vector.shape_cast %109 : vector<2x8x8xf32> to vector<16x8xf32>
    %c0_43 = arith.constant 0 : index
    %c24 = arith.constant 24 : index
    %111 = vector.load %arg16[%c0_43, %c24] : memref<16x32xf32, #tpu.memory_space<vmem>>, vector<16x8xf32>
    tpu.vector_store %arg16[%c0_43, %c24], %110 {strides = array<i32>} : memref<16x32xf32, #tpu.memory_space<vmem>>, vector<16x8xf32>,
    %c0_44 = arith.constant 0 : index
    %c0_45 = arith.constant 0 : index
    %112 = vector.load %arg16[%c0_44, %c0_45] : memref<16x32xf32, #tpu.memory_space<vmem>>, vector<16x32xf32>
    %113 = arith.truncf %112 : vector<16x32xf32> to vector<16x32xbf16>
    %c0_46 = arith.constant 0 : index
    %c0_47 = arith.constant 0 : index
    %114 = vector.load %arg11[%c0_46, %c0_47] : memref<32x32xbf16, #tpu.memory_space<vmem>>, vector<32x32xbf16>
    %cst_48 = arith.constant dense<0.000000e+00> : vector<16x32xf32>
    %115 = tpu.matmul %113, %114, %cst_48 {dimension_numbers = #tpu.dot_dimension_numbers<[1], [0], [0], [1], [0, 0, 1, 1], [], []>} : vector<16x32xbf16>, vector<32x32xbf16>, vector<16x32xf32> -> vector<16x32xf32>
    %c0_49 = arith.constant 0 : index
    %c0_50 = arith.constant 0 : index
    %116 = vector.load %arg12[%c0_49, %c0_50] : memref<1x32xf32, #tpu.memory_space<vmem>>, vector<1x32xf32>
    %117 = vector.broadcast %116 : vector<1x32xf32> to vector<16x32xf32>
    %118 = arith.addf %115, %117 : vector<16x32xf32>
    %119 = arith.addf %0, %118 : vector<16x32xf32>
    %cst_51 = arith.constant dense<0.000000e+00> : vector<16xf32>
    %120 = vector.multi_reduction <add>, %119, %cst_51 [1] : vector<16x32xf32> to vector<16xf32>
    %121 = vector.shape_cast %120 : vector<16xf32> to vector<16x1xf32>
    %cst_52 = arith.constant 3.200000e+01 : f32
    %122 = vector.broadcast %cst_52 : f32 to vector<16x1xf32>
    %123 = arith.divf %121, %122 : vector<16x1xf32>
    %124 = vector.broadcast %123 : vector<16x1xf32> to vector<16x32xf32>
    %125 = arith.subf %119, %124 : vector<16x32xf32>
    %126 = arith.mulf %125, %125 : vector<16x32xf32>
    %cst_53 = arith.constant dense<0.000000e+00> : vector<16xf32>
    %127 = vector.multi_reduction <add>, %126, %cst_53 [1] : vector<16x32xf32> to vector<16xf32>
    %128 = vector.shape_cast %127 : vector<16xf32> to vector<16x1xf32>
    %cst_54 = arith.constant 3.200000e+01 : f32
    %129 = vector.broadcast %cst_54 : f32 to vector<16x1xf32>
    %130 = arith.divf %128, %129 : vector<16x1xf32>
    %cst_55 = arith.constant 9.99999974E-6 : f32
    %131 = vector.broadcast %cst_55 : f32 to vector<16x1xf32>
    %132 = arith.addf %130, %131 : vector<16x1xf32>
    %133 = math.rsqrt %132 : vector<16x1xf32>
    %134 = vector.broadcast %133 : vector<16x1xf32> to vector<16x32xf32>
    %135 = arith.mulf %125, %134 : vector<16x32xf32>
    %c0_56 = arith.constant 0 : index
    %c0_57 = arith.constant 0 : index
    %136 = vector.load %arg13[%c0_56, %c0_57] : memref<1x32xf32, #tpu.memory_space<vmem>>, vector<1x32xf32>
    %137 = vector.broadcast %136 : vector<1x32xf32> to vector<16x32xf32>
    %138 = arith.mulf %135, %137 : vector<16x32xf32>
    %c0_58 = arith.constant 0 : index
    %c0_59 = arith.constant 0 : index
    %139 = vector.load %arg14[%c0_58, %c0_59] : memref<1x32xf32, #tpu.memory_space<vmem>>, vector<1x32xf32>
    %140 = vector.broadcast %139 : vector<1x32xf32> to vector<16x32xf32>
    %141 = arith.addf %138, %140 : vector<16x32xf32>
    %c0_60 = arith.constant 0 : index
    %c0_61 = arith.constant 0 : index
    %142 = vector.load %arg15[%c0_60, %c0_61] : memref<16x32xf32, #tpu.memory_space<vmem>>, vector<16x32xf32>
    tpu.vector_store %arg15[%c0_60, %c0_61], %141 {strides = array<i32>} : memref<16x32xf32, #tpu.memory_space<vmem>>, vector<16x32xf32>,
    return
  }
  func.func @transform_0(%arg0: i32) -> (i32, i32) {
    %c0_i32 = arith.constant 0 : i32
    %c0_i32_0 = arith.constant 0 : i32
    return %arg0, %c0_i32 : i32, i32
  }
  func.func @transform_1(%arg0: i32) -> (i32, i32) {
    %c0_i32 = arith.constant 0 : i32
    %c0_i32_0 = arith.constant 0 : i32
    return %arg0, %c0_i32 : i32, i32
  }
  func.func @transform_2(%arg0: i32) -> (i32, i32) {
    %c0_i32 = arith.constant 0 : i32
    %c0_i32_0 = arith.constant 0 : i32
    return %arg0, %c0_i32 : i32, i32
  }
  func.func @transform_3(%arg0: i32) -> (i32, i32) {
    %c0_i32 = arith.constant 0 : i32
    %c0_i32_0 = arith.constant 0 : i32
    return %arg0, %c0_i32 : i32, i32
  }
  func.func @transform_4(%arg0: i32) -> (i32, i32) {
    %c0_i32 = arith.constant 0 : i32
    %c0_i32_0 = arith.constant 0 : i32
    %c0_i32_1 = arith.constant 0 : i32
    return %c0_i32, %c0_i32_0 : i32, i32
  }
  func.func @transform_5(%arg0: i32) -> (i32, i32) {
    %c0_i32 = arith.constant 0 : i32
    %c0_i32_0 = arith.constant 0 : i32
    %c0_i32_1 = arith.constant 0 : i32
    return %c0_i32, %c0_i32_0 : i32, i32
  }
  func.func @transform_6(%arg0: i32) -> (i32, i32) {
    %c0_i32 = arith.constant 0 : i32
    %c0_i32_0 = arith.constant 0 : i32
    %c0_i32_1 = arith.constant 0 : i32
    return %c0_i32, %c0_i32_0 : i32, i32
  }
  func.func @transform_7(%arg0: i32) -> (i32, i32) {
    %c0_i32 = arith.constant 0 : i32
    %c0_i32_0 = arith.constant 0 : i32
    %c0_i32_1 = arith.constant 0 : i32
    return %c0_i32, %c0_i32_0 : i32, i32
  }
  func.func @transform_8(%arg0: i32) -> (i32, i32) {
    %c0_i32 = arith.constant 0 : i32
    %c0_i32_0 = arith.constant 0 : i32
    %c0_i32_1 = arith.constant 0 : i32
    return %c0_i32, %c0_i32_0 : i32, i32
  }
  func.func @transform_9(%arg0: i32) -> (i32, i32) {
    %c0_i32 = arith.constant 0 : i32
    %c0_i32_0 = arith.constant 0 : i32
    %c0_i32_1 = arith.constant 0 : i32
    return %c0_i32, %c0_i32_0 : i32, i32
  }
  func.func @transform_10(%arg0: i32) -> (i32, i32) {
    %c0_i32 = arith.constant 0 : i32
    %c0_i32_0 = arith.constant 0 : i32
    %c0_i32_1 = arith.constant 0 : i32
    return %c0_i32, %c0_i32_0 : i32, i32
  }
  func.func @transform_11(%arg0: i32) -> (i32, i32) {
    %c0_i32 = arith.constant 0 : i32
    %c0_i32_0 = arith.constant 0 : i32
    %c0_i32_1 = arith.constant 0 : i32
    return %c0_i32, %c0_i32_0 : i32, i32
  }
  func.func @transform_12(%arg0: i32) -> (i32, i32) {
    %c0_i32 = arith.constant 0 : i32
    %c0_i32_0 = arith.constant 0 : i32
    %c0_i32_1 = arith.constant 0 : i32
    return %c0_i32, %c0_i32_0 : i32, i32
  }
  func.func @transform_13(%arg0: i32) -> (i32, i32) {
    %c0_i32 = arith.constant 0 : i32
    %c0_i32_0 = arith.constant 0 : i32
    %c0_i32_1 = arith.constant 0 : i32
    return %c0_i32, %c0_i32_0 : i32, i32
  }
  func.func @transform_14(%arg0: i32) -> (i32, i32) {
    %c0_i32 = arith.constant 0 : i32
    %c0_i32_0 = arith.constant 0 : i32
    return %arg0, %c0_i32 : i32, i32
  }
}

</mosaic_0001>

<bundles_post_ra>
// kernel: cross_attention_layer.1
= control target key start
LH: loop header
LB: loop body
LE: loop exit
PB: predicated region body
PF: predicated region fallthrough
CT: control target
= control target key end

     0   :  { %v1585_v1 = vmov 0.0   ;;  %vm1586_vm0 = vmmov 0   ;;  %vm94_vm1 = vcmask 261120   ;;  %vm305_vm2 = vcmask 64512   ;;  %s1589_s30 = smov 104   ;;  %s1590_s15 = smov 8   ;;  %s1962_s5 = inlined_call_operand.vmem [shape: bf16[32,32], index: 5, kind: input, shape index: {}]   ;;  %s1963_s4 = inlined_call_operand.vmem [shape: bf16[32,32], index: 4, kind: input, shape index: {}]   ;;  %s1964_s2 = inlined_call_operand.vmem [shape: f32[32,32], index: 2, kind: input, shape index: {}]   ;;  %s1965_s3 = inlined_call_operand.vmem [shape: f32[32,32], index: 3, kind: input, shape index: {}]   ;;  %s1966_s0 = inlined_call_operand.vmem [shape: f32[16,32], index: 0, kind: input, shape index: {}]   ;;  %s1967_s1 = inlined_call_operand.vmem [shape: f32[16,32], index: 1, kind: input, shape index: {}]   ;;  %s1968_s6 = inlined_call_operand.vmem [shape: bf16[32,32], index: 6, kind: input, shape index: {}]   ;;  %s1969_s8 = inlined_call_operand.vmem [shape: f32[1,32], index: 8, kind: input, shape index: {}]   ;;  %s1970_s7 = inlined_call_operand.vmem [shape: f32[1,32], index: 7, kind: input, shape index: {}]   ;;  %s1971_s9 = inlined_call_operand.vmem [shape: f32[1,32], index: 9, kind: input, shape index: {}]   ;;  %s1972_s10 = inlined_call_operand.vmem [shape: bf16[32,32], index: 10, kind: input, shape index: {}]   ;;  %s1973_s11 = inlined_call_operand.vmem [shape: f32[1,32], index: 11, kind: input, shape index: {}]   ;;  %s1974_s12 = inlined_call_operand.vmem [shape: f32[1,32], index: 12, kind: input, shape index: {}]   ;;  %s1975_s13 = inlined_call_operand.vmem [shape: f32[1,32], index: 13, kind: input, shape index: {}]   ;;  %s1976_s14 = inlined_call_operand.vmem [shape: f32[16,32], index: 14, kind: output, shape index: {}]  }
   0x1   :  { %v1541_v0 = vld [vmem:[%s1962_s5] sm:$0xff]   ;;  %1405 = vmatprep.subr.bf16.mxu0 %v1585_v1  ;;  %1409 = vmatprep.mubr.msk.bf16.mxu0 %vm1586_vm0, %v1585_v1  ;;  %v1542_v2 = vld [vmem:[%s1962_s5 + $0x8] sm:$0xff]   ;;  %v57_v9 = vld [vmem:[%s1964_s2 + $0x10] sm:$0xff]  ;;  %vm398_vm3 = vcmask 130048   ;;  %s1591_s16 = smov 16   ;;  %vm739_vm4 = vcmask 130112  }
   0x2   :  { %1413 = vmatprep.subr.bf16.mxu1 %v1541_v0  ;;  %v1543_v3 = vld [vmem:[%s1963_s4] sm:$0xff]   ;;  %v56_v5 = vld [vmem:[%s1964_s2 + $0x8] sm:$0xff]  ;;  %v58_v10 = vld [vmem:[%s1964_s2 + $0x18] sm:$0xff]  ;;  %vm966_vm5 = vcmask 195712   ;;  %vm1193_vm6 = vcmask 261312  }
   0x3   :  { %1414 = vmatpush3.bf16.msra.mxu1 %v1541_v0  ;;  %v55_v4 = vld [vmem:[%s1964_s2] sm:$0xff]  ;;  %1406 = vmatpush3.bf16.msra.mxu0 %v1543_v3  ;;  %v60_v7 = vld [vmem:[%s1965_s3 + $0x8] sm:$0xff]  ;;  %v61_v12 = vld [vmem:[%s1965_s3 + $0x10] sm:$0xff]  ;;  %v70_v29 = vpack.c.bf16 %v58_v10, %v57_v9  ;;  %s1592_s2 = smov 24  }
   0x4   :  { %v59_v6 = vld [vmem:[%s1965_s3] sm:$0xff]  ;;  %1415 = vmatprep.subr.bf16.mxu1 %v1542_v2  ;;  %v64_v11 = vadd.f32 %v60_v7, %v56_v5  ;;  %1407 = vmatprep.subr.bf16.mxu0 %v1585_v1  ;;  %v62_v13 = vld [vmem:[%s1965_s3 + $0x18] sm:$0xff]  ;;  %v65_v14 = vadd.f32 %v61_v12, %v57_v9  ;;  %v1544_v16 = vld [vmem:[%s1963_s4 + $0x8] sm:$0xff]   ;;  %v69_v26 = vpack.c.bf16 %v56_v5, %v55_v4 }
   0x5   :  { %v63_v8 = vadd.f32 %v59_v6, %v55_v4  ;;  %v66_v15 = vadd.f32 %v62_v13, %v58_v10  ;;  %v1711_v17 = vld [vmem:[%s1966_s0] sm:$0xff]  ;;  %v1716_v19 = vld [vmem:[%s1966_s0 + $0x8] sm:$0xff] }
   0x6   :  { %v50_v20 = vld [vmem:[%s1967_s1] sm:$0xff]  ;;  %v51_v21 = vld [vmem:[%s1967_s1 + $0x8] sm:$0xff] }
   0x7   :  { %1416 = vmatpush3.bf16.msra.mxu1 %v1542_v2  ;;  %v67_v18 = vpack.c.bf16 %v64_v11, %v63_v8  ;;  %v68_v22 = vpack.c.bf16 %v66_v15, %v65_v14  ;;  %1408 = vmatpush3.bf16.msra.mxu0 %v1544_v16  ;;  %v52_v23 = vadd.f32 %v50_v20, %v1711_v17  ;;  %v1545_v25 = vld [vmem:[%s1968_s6] sm:$0xff]   ;;  %v1546_v28 = vld [vmem:[%s1968_s6 + $0x8] sm:$0xff]  }
   0x8   :  { %v53_v24 = vadd.f32 %v51_v21, %v1716_v19  ;;  %1429 = vmatprep.subr.bf16.mxu1 %v1585_v1  ;;  %1421 = vmatprep.subr.bf16.mxu0 %v1545_v25  ;;  %v1323_v31 = vld [vmem:[%s1969_s8] ss:$0 sm:$0xff]  ;;  %s1587_s8 = smov 120  }
   0x9   :  { %1417 = vmatprep.mubr.msk.bf16.mxu1 %vm94_vm1, %v67_v18  ;;  %v1319_v41 = vld [vmem:[%s1970_s7] ss:$0 sm:$0xff] }
   0xa   :  { %1418 = vmatmul.mubr.msk.bf16.vlgmr.msra.gmra.mrb[0].mxu1 %vm94_vm1, %v68_v22  ;;  %v54_v27 = vpack.c.bf16 %v53_v24, %v52_v23  ;;  %v1328_v50 = vld [vmem:[%s1971_s9] ss:$0 sm:$0xff]  ;;  %s1588_s9 = smov 112  }
   0xb   :  { %1431 = vmatprep.mubr.msk.bf16.mxu1 %vm1586_vm0, %v1585_v1 }
   0xc   :  { %1410 = vmatmul.mubr.msk.bf16.vlgmr.msra.gmra.mrb[0].mxu0 %vm94_vm1, %v54_v27 }
   0xd   :  { %1422 = vmatpush3.bf16.msra.mxu0 %v1545_v25  ;;  %1425 = vmatprep.mubr.msk.bf16.mxu0 %vm94_vm1, %v69_v26 }
   0xe   :  { %1423 = vmatprep.subr.bf16.mxu0 %v1546_v28 }
  0x11   :  { %1424 = vmatpush3.bf16.msra.mxu0 %v1546_v28 }
  0x12   :  { %1435 = vmatprep.subr.bf16.mxu0 %v1585_v1 }
  0x14   :  { %1426 = vmatmul.mubr.msk.bf16.vlgmr.msra.gmra.mrb[4].mxu0 %vm94_vm1, %v70_v29 }
  0x15   :  { %1437 = vmatprep.mubr.msk.bf16.mxu0 %vm1586_vm0, %v1585_v1 }
  0xdd   :  { %v1419_v30 = vpop.f32.mrb[0].mxu1 }
  0xde   :  { %v203_v32 = vpop.f32.mrb[1].mxu1  ;;  %v212_v35 = vadd.f32 %v1419_v30, %v1323_v31 }
  0xdf   :  { %v1420_v33 = vpop.f32.mrb[2].mxu1  ;;  %v132_v34 = vpop.f32.mrb[0].mxu0  ;;  %v204_v39 = vadd.f32 %v1323_v31, %v203_v32 }
  0xe0   :  { %v215_v36 = vadd.f32 %v1420_v33, %v1323_v31  ;;  %v206_v37 = vpop.f32.mrb[3].mxu1  ;;  %v1411_v38 = vpop.f32.mrb[1].mxu0  ;;  %v133_v48 = vadd.f32 %v1319_v41, %v132_v34 }
  0xe1   :  { %v207_v40 = vadd.f32 %v1323_v31, %v206_v37  ;;  %v135_v42 = vpop.f32.mrb[2].mxu0 }
  0xe2   :  { %v1749_v43 = vpack.c.bf16 %v215_v36, %v212_v35  ;;  %v1412_v44 = vpop.f32.mrb[3].mxu0  ;;  %v136_v47 = vadd.f32 %v1319_v41, %v135_v42  ;;  %v1766_v55 = vpack.c.bf16 %v133_v48, %v133_v48 }
  0xe3   :  { %v1751_v45 = vpack.c.bf16 %v207_v40, %v204_v39 }
  0xe4   :  { %v356_v46 = vsel %vm305_vm2, %v1749_v43, 0  ;;  %v1764_v52 = vpack.c.bf16 %v136_v47, %v136_v47 }
  0xe5   :  { %514 = vrot.lane.b32.xlu1 %v1751_v45, %s1587_s8  ;;  %1436 = vmatpush3.bf16.xpose.msra.mxu0 %v356_v46  ;;  %v310_v49 = vsel %vm305_vm2, %v1751_v45, 0 }
  0xe6   :  { %1430 = vmatpush3.bf16.xpose.msra.mxu1 %v310_v49  ;;  %1447 = vmatprep.subr.bf16.mxu0 %v1585_v1 }
  0xe7   :  { %v1427_v51 = vpop.f32.mrb[4].mxu0  ;;  %1441 = vmatprep.subr.bf16.mxu1 %v1585_v1 }
  0xe8   :  { %v292_v53 = vadd.f32 %v1427_v51, %v1328_v50  ;;  %v283_v54 = vpop.f32.mrb[5].mxu0 }
  0xe9   :  { %565 = vrot.lane.b32.xlu1 %v1749_v43, %s1587_s8  ;;  %v284_v56 = vadd.f32 %v1328_v50, %v283_v54  ;;  %v1428_v57 = vpop.f32.mrb[6].mxu0 }
  0xea   :  { %v295_v58 = vadd.f32 %v1428_v57, %v1328_v50  ;;  %v286_v59 = vpop.f32.mrb[7].mxu0 }
  0xeb   :  { %v287_v60 = vadd.f32 %v1328_v50, %v286_v59 }
  0xec   :  { %v1770_v61 = vpack.c.bf16 %v295_v58, %v292_v53  ;;  %1438 = vmatmul.mubr.msk.bf16.vlgmr.msra.gmra.mrb[8].mxu0 %vm305_vm2, %v1764_v52 }
  0xed   :  { %v1774_v62 = vpack.c.bf16 %v287_v60, %v284_v56  ;;  %1432 = vmatmul.mubr.msk.bf16.vlgmr.msra.gmra.mrb[4].mxu1 %vm305_vm2, %v1766_v55  ;;  %562 = vrot.lane.b32.xlu1 %v1764_v52, %s1587_s8 }
  0xee   :  { %1448 = vmatpush3.bf16.msra.mxu0 %v1770_v61  ;;  %1443 = vmatprep.mubr.msk.bf16.mxu1 %vm1586_vm0, %v1585_v1 }
  0xef   :  { %1442 = vmatpush3.bf16.msra.mxu1 %v1774_v62  ;;  %1449 = vmatprep.mubr.msk.bf16.mxu0 %vm1586_vm0, %v1585_v1 }
  0xf0   :  { %1453 = vmatprep.subr.bf16.mxu1 %v1585_v1  ;;  %1459 = vmatprep.subr.bf16.mxu0 %v1585_v1 }
  0xf1   :  { %634 = vrot.lane.b32.xlu1 %v1774_v62, %s1587_s8 }
  0xf5   :  { %744 = vrot.lane.b32.xlu1 %v1751_v45, %s1588_s9 }
  0xf9   :  { %794 = vrot.lane.b32.xlu1 %v1749_v43, %s1588_s9 }
 0x157   :  { %v515_v16 = vpop.permute.xlu1 %514 }
 0x158   :  { %v520_v22 = vsel %vm305_vm2, %v515_v16, 0 }
 0x15b   :  { %v566_v18 = vpop.permute.xlu1 %565 }
 0x15c   :  { %v571_v26 = vsel %vm305_vm2, %v566_v18, 0 }
 0x15f   :  { %v563_v24 = vpop.permute.xlu1 %562 }
 0x163   :  { %v635_v28 = vpop.permute.xlu1 %634 }
 0x167   :  { %v745_v49 = vpop.permute.xlu1 %744 }
 0x16b   :  { %v795_v50 = vpop.permute.xlu1 %794 }
 0x1bf   :  { %v392_v63 = vpop.f32.mrb[8].mxu0 }
 0x1c0   :  { %v346_v0 = vpop.f32.mrb[4].mxu1  ;;  %v1439_v2 = vpop.f32.mrb[9].mxu0  ;;  %v402_v9 = vsel %vm398_vm3, %v392_v63, -inf }
 0x1c1   :  { %v1433_v3 = vpop.f32.mrb[5].mxu1  ;;  %v395_v4 = vpop.f32.mrb[10].mxu0  ;;  %v399_v5 = vsel %vm398_vm3, %v346_v0, -inf }
 0x1c2   :  { %400 = vmax.xlane.f32.xlu0 %v399_v5  ;;  %v349_v6 = vpop.f32.mrb[6].mxu1  ;;  %v1440_v7 = vpop.f32.mrb[11].mxu0  ;;  %v800_v5 = vsel %vm305_vm2, %v795_v50, 0 }
 0x1c3   :  { %v1434_v8 = vpop.f32.mrb[7].mxu1 }
 0x1c6   :  { %403 = vmax.xlane.f32.xlu0 %v402_v9 }
 0x1dc   :  { %511 = vrot.lane.b32.xlu0 %v1766_v55, %s1587_s8 }
 0x24f   :  { %v401_v10 = vpop.xlane.xlu0 %400 }
 0x250   :  { %v405_v11 = vsub.f32 %v346_v0, %v401_v10  ;;  %v750_v0 = vsel %vm305_vm2, %v745_v49, 0 }
 0x252   :  { %v407_v12 = vmul.f32 1.442695, %v405_v11 }
 0x253   :  { %v404_v13 = vpop.xlane.xlu0 %403 }
 0x254   :  { %1549 = vpow2.f32 %v407_v12  ;;  %v406_v14 = vsub.f32 %v392_v63, %v404_v13 }
 0x256   :  { %v409_v15 = vmul.f32 1.442695, %v406_v14 }
 0x257   :  { %v512_v27 = vpop.permute.xlu0 %511 }
 0x258   :  { %1551 = vpow2.f32 %v409_v15 }
 0x25e   :  { %v1798_v20 = vpop.eup %1549 }
 0x25f   :  { %v417_v21 = vpack.c.bf16 %v1798_v20, %v1798_v20 }
 0x261   :  { %1444 = vmatmul.mubr.msk.bf16.vlgmr.msra.gmra.mrb[8].mxu1 %vm398_vm3, %v417_v21 }
 0x262   :  { %v1804_v23 = vpop.eup %1551  ;;  %1454 = vmatpush3.bf16.xpose.msra.mxu1 %v520_v22  ;;  %1455 = vmatprep.mubr.msk.bf16.mxu1 %vm1586_vm0, %v1585_v1 }
 0x263   :  { %v418_v25 = vpack.c.bf16 %v1804_v23, %v1804_v23  ;;  %1465 = vmatprep.subr.bf16.mxu1 %v1585_v1 }
 0x265   :  { %1450 = vmatmul.mubr.msk.bf16.vlgmr.msra.gmra.mrb[12].mxu0 %vm398_vm3, %v418_v25 }
 0x266   :  { %1460 = vmatpush3.bf16.xpose.msra.mxu0 %v571_v26  ;;  %1461 = vmatprep.mubr.msk.bf16.mxu0 %vm1586_vm0, %v1585_v1 }
 0x267   :  { %1471 = vmatprep.subr.bf16.mxu0 %v1585_v1 }
 0x269   :  { %1456 = vmatmul.mubr.msk.bf16.vlgmr.msra.gmra.mrb[12].mxu1 %vm305_vm2, %v512_v27 }
 0x26a   :  { %1466 = vmatpush3.bf16.msra.mxu1 %v635_v28  ;;  %1467 = vmatprep.mubr.msk.bf16.mxu1 %vm1586_vm0, %v1585_v1 }
 0x26b   :  { %1477 = vmatprep.subr.bf16.mxu1 %v1585_v1 }
 0x26d   :  { %1462 = vmatmul.mubr.msk.bf16.vlgmr.msra.gmra.mrb[16].mxu0 %vm305_vm2, %v563_v24 }
 0x26e   :  { %1473 = vmatprep.mubr.msk.bf16.mxu0 %vm1586_vm0, %v1585_v1 }
 0x334   :  { %v1823_v29 = vpop.f32.mrb[8].mxu1 }
 0x335   :  { %v1445_v30 = vpop.f32.mrb[9].mxu1 }
 0x336   :  { %v459_v31 = vpop.f32.mrb[10].mxu1 }
 0x337   :  { %v1446_v32 = vpop.f32.mrb[11].mxu1 }
 0x338   :  { %v1825_v33 = vpop.f32.mrb[12].mxu0 }
 0x339   :  { %v1451_v34 = vpop.f32.mrb[13].mxu0 }
 0x33a   :  { %v502_v35 = vpop.f32.mrb[14].mxu0 }
 0x33b   :  { %v1452_v36 = vpop.f32.mrb[15].mxu0 }
 0x33c   :  { %v556_v37 = vpop.f32.mrb[12].mxu1 }
 0x33d   :  { %v1457_v38 = vpop.f32.mrb[13].mxu1  ;;  %v613_v39 = vsel %vm398_vm3, %v556_v37, -inf }
 0x33e   :  { %614 = vmax.xlane.f32.xlu1 %v613_v39  ;;  %v559_v40 = vpop.f32.mrb[14].mxu1 }
 0x33f   :  { %v1458_v41 = vpop.f32.mrb[15].mxu1 }
 0x340   :  { %v607_v42 = vpop.f32.mrb[16].mxu0 }
 0x341   :  { %v1463_v44 = vpop.f32.mrb[17].mxu0  ;;  %v616_v46 = vsel %vm398_vm3, %v607_v42, -inf }
 0x342   :  { %617 = vmax.xlane.f32.xlu0 %v616_v46  ;;  %v610_v47 = vpop.f32.mrb[18].mxu0 }
 0x343   :  { %v1464_v48 = vpop.f32.mrb[19].mxu0 }
 0x34f   :  { %742 = vrot.lane.b32.xlu1 %v1766_v55, %s1588_s9 }
 0x353   :  { %792 = vrot.lane.b32.xlu1 %v1764_v52, %s1588_s9 }
 0x357   :  { %908 = vrot.lane.b32.xlu1 %v1770_v61, %s1588_s9 }
 0x358   :  { %681 = vrot.lane.b32.xlu0 %v1770_v61, %s1587_s8 }
 0x35c   :  { %862 = vrot.lane.b32.xlu0 %v1774_v62, %s1588_s9 }
 0x3cb   :  { %v615_v51 = vpop.xlane.xlu1 %614 }
 0x3cc   :  { %v619_v53 = vsub.f32 %v556_v37, %v615_v51 }
 0x3ce   :  { %v621_v54 = vmul.f32 1.442695, %v619_v53 }
 0x3cf   :  { %v618_v56 = vpop.xlane.xlu0 %617  ;;  %v743_v2 = vpop.permute.xlu1 %742 }
 0x3d0   :  { %1553 = vpow2.f32 %v621_v54  ;;  %v620_v57 = vsub.f32 %v607_v42, %v618_v56 }
 0x3d2   :  { %v623_v58 = vmul.f32 1.442695, %v620_v57 }
 0x3d3   :  { %v682_v59 = vpop.permute.xlu0 %681  ;;  %v793_v6 = vpop.permute.xlu1 %792 }
 0x3d4   :  { %1555 = vpow2.f32 %v623_v58  ;;  %1472 = vmatpush3.bf16.msra.mxu0 %v682_v59 }
 0x3d5   :  { %1483 = vmatprep.subr.bf16.mxu0 %v1585_v1 }
 0x3d7   :  { %v863_v7 = vpop.permute.xlu0 %862  ;;  %v909_v8 = vpop.permute.xlu1 %908 }
 0x3da   :  { %v1840_v60 = vpop.eup %1553 }
 0x3db   :  { %v631_v63 = vpack.c.bf16 %v1840_v60, %v1840_v60 }
 0x3dd   :  { %1468 = vmatmul.mubr.msk.bf16.vlgmr.msra.gmra.mrb[16].mxu1 %vm398_vm3, %v631_v63 }
 0x3de   :  { %v1846_v3 = vpop.eup %1555  ;;  %1478 = vmatpush3.bf16.xpose.msra.mxu1 %v750_v0  ;;  %1479 = vmatprep.mubr.msk.bf16.mxu1 %vm1586_vm0, %v1585_v1 }
 0x3df   :  { %v632_v4 = vpack.c.bf16 %v1846_v3, %v1846_v3  ;;  %1489 = vmatprep.subr.bf16.mxu1 %v1585_v1 }
 0x3e1   :  { %1474 = vmatmul.mubr.msk.bf16.vlgmr.msra.gmra.mrb[20].mxu0 %vm398_vm3, %v632_v4 }
 0x3e2   :  { %1484 = vmatpush3.bf16.xpose.msra.mxu0 %v800_v5  ;;  %1485 = vmatprep.mubr.msk.bf16.mxu0 %vm1586_vm0, %v1585_v1 }
 0x3e3   :  { %1495 = vmatprep.subr.bf16.mxu0 %v1585_v1 }
 0x3e5   :  { %1480 = vmatmul.mubr.msk.bf16.vlgmr.msra.gmra.mrb[20].mxu1 %vm305_vm2, %v743_v2 }
 0x3e6   :  { %1490 = vmatpush3.bf16.msra.mxu1 %v863_v7  ;;  %1491 = vmatprep.mubr.msk.bf16.mxu1 %vm1586_vm0, %v1585_v1 }
 0x3e7   :  { %1501 = vmatprep.subr.bf16.mxu1 %v1585_v1 }
 0x3e9   :  { %1486 = vmatmul.mubr.msk.bf16.vlgmr.msra.gmra.mrb[24].mxu0 %vm305_vm2, %v793_v6 }
 0x3ea   :  { %1496 = vmatpush3.bf16.msra.mxu0 %v909_v8  ;;  %1497 = vmatprep.mubr.msk.bf16.mxu0 %vm1586_vm0, %v1585_v1  ;;  %v625_v8 = vsel %vm398_vm3, %v1840_v60, 0.0 }
 0x3eb   :  { %1507 = vmatprep.subr.bf16.mxu0 %v1585_v1 }
 0x4b0   :  { %v1866_v9 = vpop.f32.mrb[16].mxu1 }
 0x4b1   :  { %v1469_v10 = vpop.f32.mrb[17].mxu1 }
 0x4b2   :  { %v677_v11 = vpop.f32.mrb[18].mxu1  ;;  %v628_v10 = vsel %vm398_vm3, %v1846_v3, 0.0 }
 0x4b3   :  { %v1470_v12 = vpop.f32.mrb[19].mxu1 }
 0x4b4   :  { %v1868_v13 = vpop.f32.mrb[20].mxu0 }
 0x4b5   :  { %v1475_v14 = vpop.f32.mrb[21].mxu0 }
 0x4b6   :  { %v724_v15 = vpop.f32.mrb[22].mxu0 }
 0x4b7   :  { %v1476_v16 = vpop.f32.mrb[23].mxu0 }
 0x4b8   :  { %v786_v18 = vpop.f32.mrb[20].mxu1 }
 0x4b9   :  { %v1481_v21 = vpop.f32.mrb[21].mxu1  ;;  %v842_v22 = vsel %vm398_vm3, %v786_v18, -inf }
 0x4ba   :  { %843 = vmax.xlane.f32.xlu1 %v842_v22  ;;  %v789_v24 = vpop.f32.mrb[22].mxu1 }
 0x4bb   :  { %v1482_v25 = vpop.f32.mrb[23].mxu1 }
 0x4bc   :  { %v836_v26 = vpop.f32.mrb[24].mxu0 }
 0x4bd   :  { %v1487_v27 = vpop.f32.mrb[25].mxu0  ;;  %v845_v28 = vsel %vm398_vm3, %v836_v26, -inf }
 0x4be   :  { %846 = vmax.xlane.f32.xlu0 %v845_v28  ;;  %v839_v30 = vpop.f32.mrb[26].mxu0  ;;  %v411_v27 = vsel %vm398_vm3, %v1798_v20, 0.0 }
 0x4bf   :  { %v1488_v31 = vpop.f32.mrb[27].mxu0  ;;  %v414_v30 = vsel %vm398_vm3, %v1804_v23, 0.0 }
 0x4cb   :  { %971 = vrot.lane.b32.xlu1 %v1751_v45, %s1589_s30 }
 0x4cf   :  { %969 = vrot.lane.b32.xlu1 %v1766_v55, %s1589_s30 }
 0x4d4   :  { %1021 = vrot.lane.b32.xlu0 %v1749_v43, %s1589_s30 }
 0x4d8   :  { %1019 = vrot.lane.b32.xlu0 %v1764_v52, %s1589_s30 }
 0x547   :  { %v844_v32 = vpop.xlane.xlu1 %843 }
 0x548   :  { %v848_v34 = vsub.f32 %v786_v18, %v844_v32 }
 0x54a   :  { %v850_v35 = vmul.f32 1.442695, %v848_v34 }
 0x54b   :  { %v847_v36 = vpop.xlane.xlu0 %846  ;;  %v972_v40 = vpop.permute.xlu1 %971 }
 0x54c   :  { %1557 = vpow2.f32 %v850_v35  ;;  %v849_v37 = vsub.f32 %v836_v26, %v847_v36  ;;  %v977_v41 = vsel %vm305_vm2, %v972_v40, 0 }
 0x54e   :  { %v852_v38 = vmul.f32 1.442695, %v849_v37 }
 0x54f   :  { %v1022_v43 = vpop.permute.xlu0 %1021  ;;  %v970_v44 = vpop.permute.xlu1 %969 }
 0x550   :  { %1559 = vpow2.f32 %v852_v38  ;;  %v1027_v42 = vsel %vm305_vm2, %v1022_v43, 0 }
 0x553   :  { %v1020_v46 = vpop.permute.xlu0 %1019 }
 0x556   :  { %v1558_v39 = vpop.eup %1557 }
 0x557   :  { %v860_v45 = vpack.c.bf16 %v1558_v39, %v1558_v39  ;;  %v854_v12 = vsel %vm398_vm3, %v1558_v39, 0.0 }
 0x559   :  { %1492 = vmatmul.mubr.msk.bf16.vlgmr.msra.gmra.mrb[24].mxu1 %vm398_vm3, %v860_v45 }
 0x55a   :  { %v1560_v55 = vpop.eup %1559  ;;  %1502 = vmatpush3.bf16.xpose.msra.mxu1 %v977_v41  ;;  %1503 = vmatprep.mubr.msk.bf16.mxu1 %vm1586_vm0, %v1585_v1 }
 0x55b   :  { %v861_v52 = vpack.c.bf16 %v1560_v55, %v1560_v55  ;;  %1513 = vmatprep.subr.bf16.mxu1 %v1585_v1  ;;  %v857_v11 = vsel %vm398_vm3, %v1560_v55, 0.0 }
 0x55d   :  { %1498 = vmatmul.mubr.msk.bf16.vlgmr.msra.gmra.mrb[28].mxu0 %vm398_vm3, %v861_v52 }
 0x55e   :  { %1508 = vmatpush3.bf16.xpose.msra.mxu0 %v1027_v42  ;;  %1509 = vmatprep.mubr.msk.bf16.mxu0 %vm1586_vm0, %v1585_v1 }
 0x55f   :  { %1519 = vmatprep.subr.bf16.mxu0 %v1585_v1 }
 0x561   :  { %1504 = vmatmul.mubr.msk.bf16.vlgmr.msra.gmra.mrb[28].mxu1 %vm305_vm2, %v970_v44 }
 0x562   :  { %1515 = vmatprep.mubr.msk.bf16.mxu1 %vm1586_vm0, %v1585_v1 }
 0x565   :  { %1510 = vmatmul.mubr.msk.bf16.vlgmr.msra.gmra.mrb[32].mxu0 %vm305_vm2, %v1020_v46 }
 0x566   :  { %1521 = vmatprep.mubr.msk.bf16.mxu0 %vm1586_vm0, %v1585_v1 }
 0x62c   :  { %v1896_v47 = vpop.f32.mrb[24].mxu1 }
 0x62d   :  { %v1493_v48 = vpop.f32.mrb[25].mxu1 }
 0x62e   :  { %v905_v49 = vpop.f32.mrb[26].mxu1 }
 0x62f   :  { %v1494_v50 = vpop.f32.mrb[27].mxu1 }
 0x630   :  { %v1898_v51 = vpop.f32.mrb[28].mxu0 }
 0x631   :  { %v1499_v53 = vpop.f32.mrb[29].mxu0 }
 0x632   :  { %v951_v54 = vpop.f32.mrb[30].mxu0 }
 0x633   :  { %v1500_v56 = vpop.f32.mrb[31].mxu0 }
 0x634   :  { %v1013_v57 = vpop.f32.mrb[28].mxu1 }
 0x635   :  { %v1505_v58 = vpop.f32.mrb[29].mxu1  ;;  %v1069_v59 = vsel %vm398_vm3, %v1013_v57, -inf }
 0x636   :  { %1070 = vmax.xlane.f32.xlu1 %v1069_v59  ;;  %v1016_v63 = vpop.f32.mrb[30].mxu1 }
 0x637   :  { %v1506_v0 = vpop.f32.mrb[31].mxu1 }
 0x638   :  { %v1063_v2 = vpop.f32.mrb[32].mxu0 }
 0x639   :  { %v1511_v4 = vpop.f32.mrb[33].mxu0  ;;  %v1072_v5 = vsel %vm398_vm3, %v1063_v2, -inf }
 0x63a   :  { %1073 = vmax.xlane.f32.xlu0 %v1072_v5  ;;  %v1066_v6 = vpop.f32.mrb[34].mxu0 }
 0x63b   :  { %v1512_v7 = vpop.f32.mrb[35].mxu0 }
 0x647   :  { %1135 = vrot.lane.b32.xlu1 %v1770_v61, %s1589_s30 }
 0x650   :  { %1089 = vrot.lane.b32.xlu0 %v1774_v62, %s1589_s30 }
 0x66b   :  { %626 = vadd.xlane.f32.xlu1 %v625_v8 }
 0x66f   :  { %629 = vadd.xlane.f32.xlu0 %v628_v10  ;;  %858 = vadd.xlane.f32.xlu1 %v857_v11  ;;  %v1351_v10 = vld [vmem:[%s1973_s11] ss:$0 sm:$0xff] }
 0x673   :  { %855 = vadd.xlane.f32.xlu0 %v854_v12 }
 0x6c3   :  { %v1071_v14 = vpop.xlane.xlu1 %1070 }
 0x6c4   :  { %v1075_v15 = vsub.f32 %v1013_v57, %v1071_v14 }
 0x6c6   :  { %v1077_v61 = vmul.f32 1.442695, %v1075_v15 }
 0x6c7   :  { %v1074_v16 = vpop.xlane.xlu0 %1073  ;;  %v1136_v18 = vpop.permute.xlu1 %1135 }
 0x6c8   :  { %1561 = vpow2.f32 %v1077_v61  ;;  %v1076_v62 = vsub.f32 %v1063_v2, %v1074_v16  ;;  %1520 = vmatpush3.bf16.msra.mxu0 %v1136_v18 }
 0x6ca   :  { %v1079_v60 = vmul.f32 1.442695, %v1076_v62 }
 0x6cb   :  { %v1090_v21 = vpop.permute.xlu0 %1089 }
 0x6cc   :  { %1563 = vpow2.f32 %v1079_v60  ;;  %1514 = vmatpush3.bf16.msra.mxu1 %v1090_v21 }
 0x6cd   :  { %1525 = vmatprep.subr.bf16.mxu1 %v1585_v1 }
 0x6d2   :  { %v1562_v3 = vpop.eup %1561 }
 0x6d3   :  { %v1081_v22 = vsel %vm398_vm3, %v1562_v3, 0.0  ;;  %v1087_v24 = vpack.c.bf16 %v1562_v3, %v1562_v3 }
 0x6d4   :  { %1082 = vadd.xlane.f32.xlu0 %v1081_v22 }
 0x6d5   :  { %1516 = vmatmul.mubr.msk.bf16.vlgmr.msra.gmra.mrb[32].mxu1 %vm398_vm3, %v1087_v24 }
 0x6d6   :  { %v1564_v25 = vpop.eup %1563  ;;  %1529 = vmatprep.mubr.msk.bf16.mxu1 %vm1586_vm0, %v1585_v1 }
 0x6d7   :  { %v1084_v26 = vsel %vm398_vm3, %v1564_v25, 0.0  ;;  %v1088_v28 = vpack.c.bf16 %v1564_v25, %v1564_v25 }
 0x6d8   :  { %1085 = vadd.xlane.f32.xlu1 %v1084_v26  ;;  %412 = vadd.xlane.f32.xlu0 %v411_v27 }
 0x6d9   :  { %1522 = vmatmul.mubr.msk.bf16.vlgmr.msra.gmra.mrb[36].mxu0 %vm398_vm3, %v1088_v28 }
 0x6dc   :  { %415 = vadd.xlane.f32.xlu1 %v414_v30 }
 0x6f8   :  { %v627_v31 = vpop.xlane.xlu1 %626 }
 0x6f9   :  { %1565 = vrcp.f32 %v627_v31 }
 0x6fc   :  { %v630_v32 = vpop.xlane.xlu0 %629  ;;  %v859_v34 = vpop.xlane.xlu1 %858 }
 0x6fd   :  { %1567 = vrcp.f32 %v630_v32 }
 0x6fe   :  { %1569 = vrcp.f32 %v859_v34 }
 0x700   :  { %v856_v35 = vpop.xlane.xlu0 %855 }
 0x701   :  { %1571 = vrcp.f32 %v856_v35 }
 0x703   :  { %v1566_v36 = vpop.eup %1565 }
 0x704   :  { %v729_v20 = vmul.f32 %v1566_v36, %v1866_v9 }
 0x706   :  { %733 = vrot.lane.b32.xlu0 %v729_v20, %s1590_s15 }
 0x707   :  { %v1568_v37 = vpop.eup %1567 }
 0x708   :  { %v1570_v38 = vpop.eup %1569  ;;  %v730_v39 = vmul.f32 %v1568_v37, %v1868_v13 }
 0x709   :  { %v957_v23 = vmul.f32 %v1570_v38, %v1898_v51  ;;  %v1355_v38 = vld [vmem:[%s1974_s12] ss:$0 sm:$0xff] }
 0x70a   :  { %735 = vrot.lane.b32.xlu1 %v730_v39, %s1590_s15 }
 0x70b   :  { %v1572_v40 = vpop.eup %1571  ;;  %962 = vrot.lane.b32.xlu0 %v957_v23, %s1591_s16 }
 0x70c   :  { %v956_v45 = vmul.f32 %v1572_v40, %v1896_v47  ;;  %v1356_v40 = vld [vmem:[%s1975_s13] ss:$0 sm:$0xff] }
 0x70e   :  { %960 = vrot.lane.b32.xlu1 %v956_v45, %s1591_s16 }
 0x761   :  { %v1083_v41 = vpop.xlane.xlu0 %1082 }
 0x765   :  { %v413_v55 = vpop.xlane.xlu0 %412  ;;  %v1086_v43 = vpop.xlane.xlu1 %1085 }
 0x766   :  { %1573 = vrcp.f32 %v413_v55 }
 0x769   :  { %v416_v9 = vpop.xlane.xlu1 %415 }
 0x76a   :  { %1575 = vrcp.f32 %v416_v9 }
 0x76b   :  { %1577 = vrcp.f32 %v1083_v41 }
 0x76c   :  { %1579 = vrcp.f32 %v1086_v43 }
 0x770   :  { %v1574_v52 = vpop.eup %1573 }
 0x771   :  { %v507_v42 = vmul.f32 %v1574_v52, %v1823_v29  ;;  %v1547_v29 = vld [vmem:[%s1972_s10] sm:$0xff]  }
 0x772   :  { %1526 = vmatpush3.bf16.msra.mxu1 %v1547_v29 }
 0x773   :  { %509 = vst.msk [vmem:[#allocation2] sm:$0xff] %vm305_vm2, %v507_v42  ;;  %1527 = vmatprep.subr.bf16.mxu1 %v1585_v1 }
 0x774   :  { %v1576_v13 = vpop.eup %1575 }
 0x775   :  { %v508_v44 = vmul.f32 %v1576_v13, %v1825_v33  ;;  %v1548_v33 = vld [vmem:[%s1972_s10 + $0x8] sm:$0xff]   ;;  %v1578_v50 = vpop.eup %1577 }
 0x776   :  { %1528 = vmatpush3.bf16.msra.mxu1 %v1548_v33  ;;  %v1580_v58 = vpop.eup %1579 }
 0x777   :  { %510 = vst.msk [vmem:[#allocation2 + $0x8] sm:$0xff] %vm305_vm2, %v508_v44 }
 0x778   :  { %v734_v46 = vpop.permute.xlu0 %733 }
 0x779   :  { %740 = vst.msk [vmem:[#allocation2] sm:$0xff] %vm739_vm4, %v734_v46 }
 0x77c   :  { %v736_v47 = vpop.permute.xlu1 %735 }
 0x77d   :  { %v963_v48 = vpop.permute.xlu0 %962  ;;  %741 = vst.msk [vmem:[#allocation2 + $0x8] sm:$0xff] %vm739_vm4, %v736_v47 }
 0x77e   :  { %968 = vst.msk [vmem:[#allocation2 + $0x8] sm:$0xff] %vm966_vm5, %v963_v48 }
 0x780   :  { %v961_v49 = vpop.permute.xlu1 %960 }
 0x781   :  { %967 = vst.msk [vmem:[#allocation2] sm:$0xff] %vm966_vm5, %v961_v49 }
 0x7a8   :  { %v1129_v51 = vpop.f32.mrb[32].mxu1 }
 0x7a9   :  { %v1183_v53 = vmul.f32 %v1578_v50, %v1129_v51  ;;  %v1517_v54 = vpop.f32.mrb[33].mxu1 }
 0x7aa   :  { %v1132_v56 = vpop.f32.mrb[34].mxu1 }
 0x7ab   :  { %1187 = vrot.lane.b32.xlu1 %v1183_v53, %s1592_s2  ;;  %v1518_v57 = vpop.f32.mrb[35].mxu1 }
 0x7ac   :  { %v1175_v59 = vpop.f32.mrb[36].mxu0 }
 0x7ad   :  { %v1184_v63 = vmul.f32 %v1580_v58, %v1175_v59  ;;  %v1523_v0 = vpop.f32.mrb[37].mxu0 }
 0x7ae   :  { %v1178_v2 = vpop.f32.mrb[38].mxu0 }
 0x7af   :  { %v1524_v4 = vpop.f32.mrb[39].mxu0  ;;  %1189 = vrot.lane.b32.xlu0 %v1184_v63, %s1592_s2 }
 0x81d   :  { %v1188_v5 = vpop.permute.xlu1 %1187 }
 0x81e   :  { %1194 = vst.msk [vmem:[#allocation2] sm:$0xff] %vm1193_vm6, %v1188_v5 }
 0x821   :  { %v1190_v1 = vpop.permute.xlu0 %1189 }
 0x822   :  { %1195 = vst.msk [vmem:[#allocation2 + $0x8] sm:$0xff] %vm1193_vm6, %v1190_v1 }
 0x825   :  { %v1196_v6 = vld [vmem:[#allocation2] sm:$0xff] }
 0x829   :  { %v1197_v7 = vld [vmem:[#allocation2 + $0x8] sm:$0xff] }
 0x82a   :  { %v1198_v8 = vpack.c.bf16 %v1197_v7, %v1196_v6 }
 0x82c   :  { %1530 = vmatmul.mubr.msk.bf16.vlgmr.msra.gmra.mrb[36].mxu1 %vm94_vm1, %v1198_v8 }
 0x8ff   :  { %v1259_v11 = vpop.f32.mrb[36].mxu1 }
 0x900   :  { %v1260_v12 = vadd.f32 %v1351_v10, %v1259_v11  ;;  %v1531_v14 = vpop.f32.mrb[37].mxu1 }
 0x901   :  { %v1262_v15 = vpop.f32.mrb[38].mxu1 }
 0x902   :  { %v1263_v61 = vadd.f32 %v1351_v10, %v1262_v15  ;;  %v1532_v16 = vpop.f32.mrb[39].mxu1  ;;  %v1266_v18 = vadd.f32 %v1260_v12, %v1711_v17 }
 0x904   :  { %v1268_v62 = vsel %vm94_vm1, %v1266_v18, 0.0  ;;  %v1267_v60 = vadd.f32 %v1263_v61, %v1716_v19 }
 0x905   :  { %1269 = vadd.xlane.f32.xlu1 %v1268_v62 }
 0x906   :  { %v1271_v21 = vsel %vm94_vm1, %v1267_v60, 0.0 }
 0x907   :  { %1272 = vadd.xlane.f32.xlu0 %v1271_v21 }
 0x992   :  { %v1270_v3 = vpop.xlane.xlu1 %1269 }
 0x993   :  { %v1275_v22 = vmul.f32 0.03125, %v1270_v3 }
 0x994   :  { %v1273_v24 = vpop.xlane.xlu0 %1272 }
 0x995   :  { %v1277_v25 = vsub.f32 %v1266_v18, %v1275_v22  ;;  %v1276_v26 = vmul.f32 0.03125, %v1273_v24 }
 0x997   :  { %v1278_v27 = vsub.f32 %v1267_v60, %v1276_v26  ;;  %v1279_v28 = vmul.f32 %v1277_v25, %v1277_v25 }
 0x999   :  { %v1281_v30 = vsel %vm94_vm1, %v1279_v28, 0.0  ;;  %v1280_v31 = vmul.f32 %v1278_v27, %v1278_v27 }
 0x99a   :  { %1282 = vadd.xlane.f32.xlu0 %v1281_v30 }
 0x99b   :  { %v1284_v17 = vsel %vm94_vm1, %v1280_v31, 0.0 }
 0x99c   :  { %1285 = vadd.xlane.f32.xlu1 %v1284_v17 }
 0xa27   :  { %v1283_v32 = vpop.xlane.xlu0 %1282 }
 0xa28   :  { %v1287_v19 = vmul.f32 0.03125, %v1283_v32 }
 0xa29   :  { %v1286_v34 = vpop.xlane.xlu1 %1285 }
 0xa2a   :  { %v1289_v35 = vadd.f32 1e-05, %v1287_v19  ;;  %v1288_v36 = vmul.f32 0.03125, %v1286_v34 }
 0xa2c   :  { %1581 = vrsqrt.f32 %v1289_v35  ;;  %v1290_v20 = vadd.f32 1e-05, %v1288_v36 }
 0xa2e   :  { %1583 = vrsqrt.f32 %v1290_v20 }
 0xa36   :  { %v1582_v37 = vpop.eup %1581 }
 0xa37   :  { %v1293_v39 = vmul.f32 %v1582_v37, %v1277_v25 }
 0xa38   :  { %v1584_v23 = vpop.eup %1583 }
 0xa39   :  { %v1302_v45 = vmul.f32 %v1355_v38, %v1293_v39  ;;  %v1294_v41 = vmul.f32 %v1584_v23, %v1278_v27 }
 0xa3b   :  { %v1311_v55 = vadd.f32 %v1356_v40, %v1302_v45  ;;  %v1303_v43 = vmul.f32 %v1355_v38, %v1294_v41 }
 0xa3d   :  { %1313 = vst.msk [vmem:[%s1976_s14] sm:$0xff] %vm94_vm1, %v1311_v55  ;;  %v1312_v9 = vadd.f32 %v1356_v40, %v1303_v43 }
 0xa3f   :  { %1314 = vst.msk [vmem:[%s1976_s14 + $0x8] sm:$0xff] %vm94_vm1, %v1312_v9 }

</bundles_post_ra>
